<compile_context>
chip_gen: v7x
topology: tpu7x:2x2x1
jax: 0.10.0
libtpu: 0.0.40
codegen_flags: <defaults>
</compile_context>

<pallas_src>
import math
import jax
import jax.numpy as jnp
from jax.experimental import pallas as pl
from jax.experimental.pallas import tpu as pltpu


def _build_encoding(seq_len: int, model_dim: int) -> jnp.ndarray:
    """Deterministic sinusoidal table, matching the torch __init__ exactly."""
    position = jnp.arange(seq_len, dtype=jnp.float32)[:, None]               # (S, 1)
    div_term = jnp.exp(
        jnp.arange(0, model_dim, 2, dtype=jnp.float32) * -(math.log(10000.0) / model_dim)
    )                                                                         # (ceil(D/2),)
    angles = position * div_term                                              # (S, ceil(D/2))
    enc = jnp.zeros((seq_len, model_dim), dtype=jnp.float32)
    enc = enc.at[:, 0::2].set(jnp.sin(angles))
    enc = enc.at[:, 1::2].set(jnp.cos(angles)[:, : model_dim // 2])
    return enc                                                                # (S, D)


def prepare_encoding(encoding: jnp.ndarray, S: int, dtype) -> jnp.ndarray:
    """Slice/cast/flatten the table once, outside the per-call hot path."""
    return encoding[:S, :].astype(dtype).reshape(1, -1)                      # (1, S*D)


def _sublane_align(dtype) -> int:
    """Dense-packing sublane alignment: 8 for 32-bit, 16 for 16-bit, 32 for 8-bit."""
    bits = jnp.dtype(dtype).itemsize * 8
    if bits >= 32:
        return 8
    if bits == 16:
        return 16
    return 32


_TARGET_BLOCK_BYTES = 4 * 1024 * 1024     # ~4 MiB per x/out tile (review: v7x/v6e win)
_VMEM_LIMIT_BYTES = 32 * 1024 * 1024      # explicit: above v5e's 16 MiB default scoped
                                          # limit, under v7x's 64 MiB physical VMEM.


def _pick_lane_tile(F: int, itemsize: int, sub_align: int) -> int:
    """Lane tile: a multiple of 128 sized against the minimum sublane count, or the
    full extent when F < 128. Never falls back to a giant full-F block for big F."""
    if F <= 128:
        return F                                       # full extent (always legal)
    max_tf = (_TARGET_BLOCK_BYTES // (itemsize * sub_align)) // 128 * 128
    max_tf = max(128, max_tf)
    return min(max_tf, (F // 128) * 128)               # multiple of 128 <= F


def _pick_sublane_tile(B: int, itemsize: int, tF: int, sub_align: int) -> int:
    """Sublane tile: dtype-aligned multiple that keeps the block near the target size."""
    if B <= sub_align:
        return B                                       # full extent (always legal)
    max_b = (_TARGET_BLOCK_BYTES // (itemsize * tF)) // sub_align * sub_align
    max_b = max(sub_align, max_b)
    return min(max_b, (B // sub_align) * sub_align)    # multiple of sub_align <= B


def _pe_kernel(x_ref, enc_ref, o_ref):
    # x_ref / o_ref: (bB, tF) lane-dense tile; enc_ref: (1, tF) shared row.
    # (1, tF) + (bB, tF) is a cheap sublane broadcast on the VPU; kernel is HBM-bound.
    o_ref[...] = x_ref[...] + enc_ref[...]


def positional_encoding(x: jnp.ndarray, enc2: jnp.ndarray) -> jnp.ndarray:
    """x: (B, S, D); enc2: (1, S*D) pre-flattened encoding (see prepare_encoding)."""
    B, S, D = x.shape
    F = S * D
    assert enc2.shape == (1, F)

    # Lane-dense flatten: last dim becomes S*D (row-major reshape is layout-free).
    x2 = x.reshape(B, F)

    itemsize = jnp.dtype(x.dtype).itemsize
    sub_align = _sublane_align(x.dtype)

    # Lane tile first (long contiguous DMA runs), then batch tile from the remainder.
    tF = _pick_lane_tile(F, itemsize, sub_align)
    bB = _pick_sublane_tile(B, itemsize, tF, sub_align)

    # Feature axis OUTER, batch axis INNER: enc's block index (0, f) only changes
    # once per f-tile, so it is fetched nF times total (== F bytes), not nF*nB times.
    grid = (pl.cdiv(F, tF), pl.cdiv(B, bB))

    out2 = pl.pallas_call(
        _pe_kernel,
        out_shape=jax.ShapeDtypeStruct((B, F), x.dtype),
        grid_spec=pltpu.PrefetchScalarGridSpec(
            num_scalar_prefetch=0,
            grid=grid,
            in_specs=[
                pl.BlockSpec((bB, tF), lambda f, b: (b, f)),   # x
                pl.BlockSpec((1, tF), lambda f, b: (0, f)),    # encoding row
            ],
            out_specs=pl.BlockSpec((bB, tF), lambda f, b: (b, f)),
        ),
        compiler_params=pltpu.CompilerParams(
            dimension_semantics=("parallel", "parallel"),
            vmem_limit_bytes=_VMEM_LIMIT_BYTES,
        ),
    )(x2, enc2)

    return out2.reshape(B, S, D)


if __name__ == "__main__":
    B, seq_len, model_dim = 2, 8, 32
    key = jax.random.PRNGKey(0)
    x = jax.random.normal(key, (B, seq_len, model_dim), dtype=jnp.float32)

    encoding = _build_encoding(seq_len, model_dim)        # buffer from __init__
    enc2 = prepare_encoding(encoding, seq_len, x.dtype)   # once, outside hot path

    out = positional_encoding(x, enc2)
    jax.block_until_ready(out)

    # reference check in plain JAX
    ref = x + encoding[None, :seq_len, :]
    assert out.shape == (B, seq_len, model_dim)
    assert jnp.allclose(out, ref, atol=1e-6), "mismatch vs reference"

    print("KERNEL_OK")
</pallas_src>

<mosaic_0001>
module attributes {stable_mosaic.version = 11 : i64} {
  func.func @_pe_kernel(%arg0: i32, %arg1: i32, %arg2: memref<2x256xf32, #tpu.memory_space<vmem>>, %arg3: memref<1x256xf32, #tpu.memory_space<vmem>>, %arg4: memref<2x256xf32, #tpu.memory_space<vmem>>) attributes {dimension_semantics = [#tpu.dimension_semantics<parallel>, #tpu.dimension_semantics<parallel>], iteration_bounds = array<i64: 1, 1>, scalar_prefetch = 0 : i64, scratch_operands = 0 : i64, tpu.core_type = #tpu.core_type<tc>, window_params = [{transform_indices = @transform_0, window_bounds = array<i64: 2, 256>}, {transform_indices = @transform_1, window_bounds = array<i64: 1, 256>}, {transform_indices = @transform_2, window_bounds = array<i64: 2, 256>}]} {
    %c0 = arith.constant 0 : index
    %c0_0 = arith.constant 0 : index
    %0 = vector.load %arg2[%c0, %c0_0] : memref<2x256xf32, #tpu.memory_space<vmem>>, vector<2x256xf32>
    %c0_1 = arith.constant 0 : index
    %c0_2 = arith.constant 0 : index
    %1 = vector.load %arg3[%c0_1, %c0_2] : memref<1x256xf32, #tpu.memory_space<vmem>>, vector<1x256xf32>
    %2 = vector.broadcast %1 : vector<1x256xf32> to vector<2x256xf32>
    %3 = arith.addf %0, %2 : vector<2x256xf32>
    %c0_3 = arith.constant 0 : index
    %c0_4 = arith.constant 0 : index
    %4 = vector.load %arg4[%c0_3, %c0_4] : memref<2x256xf32, #tpu.memory_space<vmem>>, vector<2x256xf32>
    tpu.vector_store %arg4[%c0_3, %c0_4], %3 {strides = array<i32>} : memref<2x256xf32, #tpu.memory_space<vmem>>, vector<2x256xf32>,
    return
  }
  func.func @transform_0(%arg0: i32, %arg1: i32) -> (i32, i32) {
    %c0_i32 = arith.constant 0 : i32
    return %arg1, %arg0 : i32, i32
  }
  func.func @transform_1(%arg0: i32, %arg1: i32) -> (i32, i32) {
    %c0_i32 = arith.constant 0 : i32
    %c0_i32_0 = arith.constant 0 : i32
    return %c0_i32, %arg0 : i32, i32
  }
  func.func @transform_2(%arg0: i32, %arg1: i32) -> (i32, i32) {
    %c0_i32 = arith.constant 0 : i32
    return %arg1, %arg0 : i32, i32
  }
}

</mosaic_0001>

<bundles_post_ra>
// kernel: tpu_custom_call.1
= control target key start
LH: loop header
LB: loop body
LE: loop exit
PB: predicated region body
PF: predicated region fallthrough
CT: control target
= control target key end

     0   :  { %7 = vsyncpa [#allocation3], 0  ;;  %s157_s0 = inlined_call_operand.hbm [shape: f32[2,256], index: 0, kind: input, shape index: {}]   ;;  %s158_s1 = inlined_call_operand.vmem [shape: f32[1,256], index: 1, kind: input, shape index: {}]   ;;  %s159_s2 = inlined_call_operand.hbm [shape: f32[2,256], index: 2, kind: output, shape index: {}]  }
   0x1   :  { %8 = vsyncpa [#allocation4], 0  ;;  %s112_s9 = smov [#allocation2]   ;;  %s64_s13 = scalar_lea.hbm %s157_s0, 64 }
   0x2   :  { %s15_s10 = sshll.u32 %s112_s9, 4  ;;  %p65_p0 = scmp.ne.s32.totalorder %s157_s0, %s64_s13  ;;  %s16_s10 = int_to_ptr.vmem [resolvable:$true] %s15_s10 }
   0x3   :  { %p68_p1 = scmp.lt.u32.totalorder %s64_s13, %s157_s0 }
   0x5   :  { %p70_p2 = pnand %p68_p1, %p65_p0 }
   0x7   :  { %73 = shalt.err (!%p70_p2)
}
   0x8   :  { %s74_s18 = scalar_lea.vmem %s16_s10, 64  ;;  %p79_p4 = scmp.lt.s32.totalorder %s16_s10, %s16_s10 }
   0x9   :  { %p75_p3 = scmp.ne.s32.totalorder %s16_s10, %s74_s18  ;;  %p80_p5 = scmp.lt.s32.totalorder %s74_s18, %s74_s18 }
   0xb   :  { %p81_p6 = por %p80_p5, %p79_p4 }
   0xd   :  { %p82_p7 = pnand %p81_p6, %p75_p3 }
   0xf   :  { %85 = shalt.err (!%p82_p7)
}
  0x10   :  { %18 = dma.hbm_to_vmem [thread:$0]  %s157_s0, 64, %s16_s10, [#allocation3]  }
  0x11   :  { %108 = dma.done.wait [#allocation3], 64  }
  0x12   :  { %109 = vsyncadd [#allocation3], 4294967232  ;;  %v27_v0 = vlaneseq  ;;  %v113_v1 = vmov 1983009808   ;;  %v25_v7 = vld [vmem:[%s158_s1] sm:$0x3] }
  0x13   :  { %v37_v2 = vunpack.c.l.s4 %v113_v1  ;;  %v24_v12 = vld [vmem:[#allocation2] sm:$0xf]  ;;  %s114_s23 = smov [#allocation5]  }
  0x14   :  { %v28_v3 = vshrl.u32 %v27_v0, 7  ;;  %s52_s0 = sshll.u32 %s114_s23, 4  ;;  %s53_s0 = int_to_ptr.vmem [resolvable:$true] %s52_s0 }
  0x15   :  { %v38_v6 = vunpack.c.0.s8 %v37_v2  ;;  %s86_s24 = scalar_lea.vmem %s53_s0, 64  ;;  %p91_p9 = scmp.lt.s32.totalorder %s53_s0, %s53_s0 }
  0x16   :  { %v29_v4 = vsub.s32 0, %v28_v3  ;;  %v33_v5 = vsub.s32 1, %v28_v3  ;;  %p87_p8 = scmp.ne.s32.totalorder %s53_s0, %s86_s24  ;;  %p92_p10 = scmp.lt.s32.totalorder %s86_s24, %s86_s24 }
  0x17   :  { %v41_v10 = vsub.s32 %v38_v6, %v28_v3 }
  0x18   :  { %v30_v8 = vrot.slane %v25_v7, %v29_v4  ;;  %v34_v9 = vrot.slane %v25_v7, %v33_v5  ;;  %p93_p11 = por %p92_p10, %p91_p9 }
  0x1a   :  { %v35_v11 = vcombine.low %v30_v8, %v34_v9  ;;  %p94_p12 = pnand %p93_p11, %p87_p8 }
  0x1c   :  { %v42_v13 = vrot.slane %v35_v11, %v41_v10 }
  0x1e   :  { %v44_v14 = vadd.f32 %v42_v13, %v24_v12 }
  0x20   :  { %45 = vst [vmem:[#allocation5] sm:$0xf] %v44_v14 }
  0x21   :  { %97 = shalt.err (!%p94_p12)
}
  0x22   :  { %s98_s26 = scalar_lea.hbm %s159_s2, 64 }
  0x23   :  { %p99_p13 = scmp.ne.s32.totalorder %s159_s2, %s98_s26  ;;  %p102_p0 = scmp.lt.u32.totalorder %s98_s26, %s159_s2 }
  0x25   :  { %p104_p1 = pnand %p102_p0, %p99_p13 }
  0x27   :  { %107 = shalt.err (!%p104_p1)
}
  0x28   :  { %55 = dma.vmem_to_hbm [thread:$0]  %s53_s0, 64, %s159_s2, [#allocation4]  }
  0x29   :  { %110 = dma.done.wait [#allocation4], 64  }
  0x2a   :  { %111 = vsyncadd [#allocation4], 4294967232 }
  0x2b   :  { %59 = vsyncpa [#allocation3], 1 }
  0x2c   :  { %60 = vsyncpa [#allocation4], 1 }

</bundles_post_ra>
